<compile_context>
chip_gen: v7x
topology: tpu7x:2x2x1
jax: 0.10.0
libtpu: 0.0.40
codegen_flags: <defaults>
</compile_context>

<pallas_src>
import jax
import jax.numpy as jnp
from jax.experimental import pallas as pl
from jax.experimental.pallas import tpu as pltpu


# ---------------------------------------------------------------------------
# Constant packing (done once per model instance, outside the per-call path).
# ---------------------------------------------------------------------------
def pack_consts(H, A0):
    """Keep only the live parameters: H rows 1 and 2, and A0[1]. -> (7,) f32"""
    H = jnp.asarray(H, jnp.float32)
    A0 = jnp.asarray(A0, jnp.float32).reshape(-1)
    assert A0.shape[0] >= 2, "calc_scale reads A0[1]; need len(A0) >= 2"
    return jnp.concatenate([H[1, :], H[2, :], A0[1:2]])  # (7,)


# ---------------------------------------------------------------------------
# Single-point kernel: one packed SMEM operand, 1-D SMEM output, scalar path.
# ---------------------------------------------------------------------------
def _calc_scale_scalar_kernel(packed_ref, o_ref):
    # packed_ref: SMEM (16,) f32 = [p0, p1, h10, h11, h12, h20, h21, h22, a01, pad...]
    # o_ref:      SMEM (1,)  f32
    p0 = packed_ref[0]
    p1 = packed_ref[1]
    y1 = packed_ref[2] * p0 + packed_ref[3] * p1 + packed_ref[4]
    y2 = packed_ref[5] * p0 + packed_ref[6] * p1 + packed_ref[7]
    o_ref[0] = y1 / y2 + packed_ref[8]


def calc_scale(point, consts):
    """point: (2,) f32, consts: (7,) f32 from pack_consts -> (1,) f32."""
    point = jnp.asarray(point, jnp.float32).reshape(-1)[:2]
    packed = jnp.concatenate(
        [point, jnp.asarray(consts, jnp.float32), jnp.zeros((7,), jnp.float32)]
    )  # (16,)
    return pl.pallas_call(
        _calc_scale_scalar_kernel,
        out_shape=jax.ShapeDtypeStruct((1,), jnp.float32),
        in_specs=[pl.BlockSpec(memory_space=pltpu.MemorySpace.SMEM)],
        out_specs=pl.BlockSpec(memory_space=pltpu.MemorySpace.SMEM),
        cost_estimate=pl.CostEstimate(
            flops=9, transcendentals=0, bytes_accessed=16 * 4 + 4
        ),
    )(packed)


# ---------------------------------------------------------------------------
# Batched kernel: lane-dense VMEM tiles, constants via scalar prefetch (SMEM).
# ---------------------------------------------------------------------------
def _calc_scale_batched_kernel(c_ref, px_ref, py_ref, o_ref):
    # c_ref : SMEM (7,) f32 = [h10, h11, h12, h20, h21, h22, a01]
    # px_ref/py_ref/o_ref: VMEM (block_rows, 128) f32
    px = px_ref[...]
    py = py_ref[...]
    y1 = c_ref[0] * px + c_ref[1] * py + c_ref[2]
    y2 = c_ref[3] * px + c_ref[4] * py + c_ref[5]
    o_ref[...] = y1 / y2 + c_ref[6]


def calc_scale_batched(points, consts, *, block_rows=8):
    """points: (N, 2) f32, consts: (7,) f32 -> (N,) f32 scales."""
    points = jnp.asarray(points, jnp.float32)
    consts = jnp.asarray(consts, jnp.float32)
    n = points.shape[0]
    lane = 128
    tile = block_rows * lane
    n_pad = ((n + tile - 1) // tile) * tile
    pad = n_pad - n
    # Present each coordinate as a lane-dense (rows, 128) slab.
    px = jnp.pad(points[:, 0], (0, pad)).reshape(n_pad // lane, lane)
    py = jnp.pad(points[:, 1], (0, pad)).reshape(n_pad // lane, lane)
    rows = n_pad // lane
    grid = (rows // block_rows,)

    out = pl.pallas_call(
        _calc_scale_batched_kernel,
        out_shape=jax.ShapeDtypeStruct((rows, lane), jnp.float32),
        grid_spec=pltpu.PrefetchScalarGridSpec(
            num_scalar_prefetch=1,
            grid=grid,
            in_specs=[
                pl.BlockSpec((block_rows, lane), lambda i, c: (i, 0)),
                pl.BlockSpec((block_rows, lane), lambda i, c: (i, 0)),
            ],
            out_specs=pl.BlockSpec((block_rows, lane), lambda i, c: (i, 0)),
        ),
        compiler_params=pltpu.CompilerParams(
            dimension_semantics=("parallel",)  # v7x: shard grid over both TCs
        ),
        cost_estimate=pl.CostEstimate(
            flops=9 * n_pad, transcendentals=0, bytes_accessed=3 * n_pad * 4 + 7 * 4
        ),
    )(consts, px, py)
    return out.reshape(-1)[:n]


if __name__ == "__main__":
    key = jax.random.PRNGKey(0)
    k_h, k_a, k_p, k_b = jax.random.split(key, 4)

    # Deterministic "module parameters": a well-conditioned homography H and
    # an offset vector A0 (only A0[1] is read by the forward pass).
    H = jnp.eye(3, dtype=jnp.float32) + 0.1 * jax.random.normal(k_h, (3, 3), jnp.float32)
    A0 = jax.random.normal(k_a, (3,), jnp.float32)
    consts = pack_consts(H, A0)  # built once, outside the per-call hot path

    # --- single-point path (exact PyTorch module semantics) ---------------
    point = jax.random.normal(k_p, (2,), jnp.float32)
    out = jax.block_until_ready(calc_scale(point, consts))

    x = jnp.array([[point[0]], [point[1]], [1.0]], jnp.float32)
    x = H @ x
    x = x / x[-1]
    ref = x[1] + A0[1]                       # shape (1,)
    assert out.shape == (1,), out.shape
    assert jnp.allclose(out, ref, rtol=1e-5, atol=1e-5), (out, ref)

    # --- batched path (amortizes dispatch cost over many points) ----------
    n = 2048
    points = jax.random.normal(k_b, (n, 2), jnp.float32)
    out_b = jax.block_until_ready(calc_scale_batched(points, consts))

    y1 = points[:, 0] * H[1, 0] + points[:, 1] * H[1, 1] + H[1, 2]
    y2 = points[:, 0] * H[2, 0] + points[:, 1] * H[2, 1] + H[2, 2]
    ref_b = y1 / y2 + A0[1]
    assert out_b.shape == (n,), out_b.shape
    assert jnp.allclose(out_b, ref_b, rtol=1e-5, atol=1e-5)

    print("KERNEL_OK")
</pallas_src>

<mosaic_0001>
module attributes {stable_mosaic.version = 11 : i64} {
  func.func @_calc_scale_scalar_kernel(%arg0: memref<16xf32, #tpu.memory_space<smem>>, %arg1: memref<1xf32, #tpu.memory_space<smem>>) attributes {dimension_semantics = [], scalar_prefetch = 0 : i64, scratch_operands = 0 : i64, tpu.core_type = #tpu.core_type<tc>} {
    %c0 = arith.constant 0 : index
    %0 = memref.load %arg0[%c0] : memref<16xf32, #tpu.memory_space<smem>>
    %c1 = arith.constant 1 : index
    %1 = memref.load %arg0[%c1] : memref<16xf32, #tpu.memory_space<smem>>
    %c2 = arith.constant 2 : index
    %2 = memref.load %arg0[%c2] : memref<16xf32, #tpu.memory_space<smem>>
    %3 = arith.mulf %2, %0 : f32
    %c3 = arith.constant 3 : index
    %4 = memref.load %arg0[%c3] : memref<16xf32, #tpu.memory_space<smem>>
    %5 = arith.mulf %4, %1 : f32
    %6 = arith.addf %3, %5 : f32
    %c4 = arith.constant 4 : index
    %7 = memref.load %arg0[%c4] : memref<16xf32, #tpu.memory_space<smem>>
    %8 = arith.addf %6, %7 : f32
    %c5 = arith.constant 5 : index
    %9 = memref.load %arg0[%c5] : memref<16xf32, #tpu.memory_space<smem>>
    %10 = arith.mulf %9, %0 : f32
    %c6 = arith.constant 6 : index
    %11 = memref.load %arg0[%c6] : memref<16xf32, #tpu.memory_space<smem>>
    %12 = arith.mulf %11, %1 : f32
    %13 = arith.addf %10, %12 : f32
    %c7 = arith.constant 7 : index
    %14 = memref.load %arg0[%c7] : memref<16xf32, #tpu.memory_space<smem>>
    %15 = arith.addf %13, %14 : f32
    %16 = arith.divf %8, %15 : f32
    %c8 = arith.constant 8 : index
    %17 = memref.load %arg0[%c8] : memref<16xf32, #tpu.memory_space<smem>>
    %18 = arith.addf %16, %17 : f32
    %c0_0 = arith.constant 0 : index
    %19 = memref.load %arg1[%c0_0] : memref<1xf32, #tpu.memory_space<smem>>
    memref.store %18, %arg1[%c0_0] : memref<1xf32, #tpu.memory_space<smem>>
    return
  }
}

</mosaic_0001>

<bundles_post_ra>
// kernel: tpu_custom_call.1
= control target key start
LH: loop header
LB: loop body
LE: loop exit
PB: predicated region body
PF: predicated region fallthrough
CT: control target
= control target key end

     0   :  { %6 = vsyncpa [#allocation3], 0  ;;  %s132_s0 = inlined_call_operand.hbm [shape: f32[16], index: 0, kind: input, shape index: {}]   ;;  %s133_s1 = inlined_call_operand.hbm [shape: f32[1], index: 1, kind: output, shape index: {}]  }
   0x1   :  { %7 = vsyncpa [#allocation4], 0  ;;  %s72_s8 = scalar_lea.hbm %s132_s0, 16 }
   0x2   :  { %p73_p0 = scmp.ne.s32.totalorder %s132_s0, %s72_s8  ;;  %p76_p1 = scmp.lt.u32.totalorder %s72_s8, %s132_s0 }
   0x4   :  { %p78_p2 = pnand %p76_p1, %p73_p0 }
   0x6   :  { %81 = shalt.err (!%p78_p2)
}
   0x7   :  { %s96_s13 = smov [#allocation2]  }
   0x8   :  { %15 = dma.hbm_to_smem %s132_s0, 16, %s96_s13, [#allocation3]  }
   0x9   :  { %92 = dma.done.wait [#allocation3], 16  }
   0xa   :  { %93 = vsyncadd [#allocation3], 4294967280 }
   0xb   :  { %19 = sfence }
   0xc   :  { %s20_s16 = sld [smem:[#allocation2]]  ;;  %s58_s17 = sld [smem:[#allocation2 + $0x1]] }
   0xd   :  { %s62_s18 = sld [smem:[#allocation2 + $0x5]]  ;;  %s63_s19 = sld [smem:[#allocation2 + $0x6]] }
   0xe   :  { %s59_s20 = sld [smem:[#allocation2 + $0x2]]  ;;  %s60_s21 = sld [smem:[#allocation2 + $0x3]] }
   0xf   :  { %s64_s22 = sld [smem:[#allocation2 + $0x7]]  ;;  %s61_s0 = sld [smem:[#allocation2 + $0x4]] }
  0x10   :  { %s65_s30 = sld [smem:[#allocation2 + $0x8]]  ;;  %s82_s8 = scalar_lea.hbm %s133_s1, 16 }
  0x11   :  { %p83_p3 = scmp.ne.s32.totalorder %s133_s1, %s82_s8  ;;  %p86_p4 = scmp.lt.u32.totalorder %s82_s8, %s133_s1 }
  0x13   :  { %s30_s23 = smul.f32 %s62_s18, %s20_s16  ;;  %p88_p5 = pnand %p86_p4, %p83_p3 }
  0x14   :  { %s32_s24 = smul.f32 %s63_s19, %s58_s17 }
  0x15   :  { %s23_s25 = smul.f32 %s59_s20, %s20_s16 }
  0x16   :  { %s33_s26 = sadd.f32 %s32_s24, %s30_s23  ;;  %s25_s27 = smul.f32 %s60_s21, %s58_s17 }
  0x18   :  { %s35_s28 = sadd.f32 %s64_s22, %s33_s26 }
  0x19   :  { %s26_s29 = sadd.f32 %s25_s27, %s23_s25 }
  0x1a   :  { %v36_v0 = vstv %s35_s28 }
  0x1b   :  { %70 = vrcp.f32 %v36_v0  ;;  %s28_s2 = sadd.f32 %s61_s0, %s26_s29 }
  0x25   :  { %v71_v1 = vpop.eup %70 }
  0x26   :  { %66 = vpush %v71_v1 }
  0x57   :  { %s67_s3 = spop %66 }
  0x58   :  { %s39_s4 = smul.f32 %s67_s3, %s28_s2 }
  0x5a   :  { %s41_s5 = sadd.f32 %s65_s30, %s39_s4 }
  0x5c   :  { %43 = sst [smem:[#allocation5]] %s41_s5 }
  0x5d   :  { %91 = shalt.err (!%p88_p5)
}
  0x5e   :  { %s97_s13 = smov [#allocation5]  }
  0x5f   :  { %51 = dma.smem_to_hbm %s97_s13, 16, %s133_s1, [#allocation4]  }
  0x60   :  { %94 = dma.done.wait [#allocation4], 16  }
  0x61   :  { %95 = vsyncadd [#allocation4], 4294967280 }
  0x62   :  { %55 = sfence }
  0x63   :  { %56 = vsyncpa [#allocation3], 1 }
  0x64   :  { %57 = vsyncpa [#allocation4], 1 }

</bundles_post_ra>
